<compile_context>
chip_gen: v7x
topology: tpu7x:2x2x1
jax: 0.10.0
libtpu: 0.0.40
codegen_flags: <defaults>
</compile_context>

<pallas_src>
import functools

import jax
import jax.numpy as jnp
from jax.experimental import pallas as pl
from jax.experimental.pallas import tpu as pltpu


def _ffn_kernel(x_ref, w1_ref, b1_ref, w2_ref, b2_ref, o_ref):
    """One tile of rows: o = relu(x @ W1 + b1) @ W2 + b2."""
    x = x_ref[...]                                              # (tile_rows, d_in)
    # dense1 + ReLU (MXU matmul, f32 accumulation)
    h = jnp.dot(x, w1_ref[...], preferred_element_type=jnp.float32)
    h = jnp.maximum(h + b1_ref[...].astype(jnp.float32), 0.0)   # (tile_rows, d_hid)
    # dense2
    out = jnp.dot(h.astype(w2_ref.dtype), w2_ref[...],
                  preferred_element_type=jnp.float32)
    out = out + b2_ref[...].astype(jnp.float32)                 # (tile_rows, d_out)
    o_ref[...] = out.astype(o_ref.dtype)


def _pick_tile_rows(rows, d_in, d_hid, d_out, itemsize,
                    vmem_budget_bytes=32 * 1024 * 1024):
    """Largest multiple-of-8 row tile that fits the VMEM budget."""
    # Bytes that scale with tile_rows: double-buffered x / out tiles plus the
    # f32 intermediates (x promoted, hidden, output) held live during compute.
    per_row = 2 * (d_in + d_out) * itemsize + (d_in + d_hid + d_out) * 4
    # Grid-invariant weights & biases (still double-buffered by the pipeline).
    fixed = 2 * (d_in * d_hid + d_hid * d_out + d_hid + d_out) * itemsize
    avail = max(vmem_budget_bytes - fixed, per_row * 8)
    t = max(8, min(int(avail // per_row), 1024))
    t = (t // 8) * 8
    # No point tiling wider than the (8-rounded) number of rows.
    rows_pad8 = ((rows + 7) // 8) * 8
    return max(8, min(t, rows_pad8))


def position_wise_ffn(x, w1, b1, w2, b2, *, tile_rows=None):
    """Position-wise FFN:  relu(x @ w1 + b1) @ w2 + b2  over the last dim of x."""
    orig_shape = x.shape
    d_in = orig_shape[-1]
    d_hid = w1.shape[1]
    d_out = w2.shape[1]
    assert w1.shape == (d_in, d_hid)
    assert w2.shape == (d_hid, d_out)

    rows = 1
    for d in orig_shape[:-1]:
        rows *= d
    x2 = x.reshape(rows, d_in)
    b1_2 = b1.reshape(1, d_hid)
    b2_2 = b2.reshape(1, d_out)

    itemsize = jnp.dtype(x.dtype).itemsize
    if tile_rows is None:
        tile_rows = _pick_tile_rows(rows, d_in, d_hid, d_out, itemsize)

    # Pad rows so the grid divides evenly (rows are independent, padding is
    # simply dropped afterwards).  Avoids the old hard assert.
    rows_padded = pl.cdiv(rows, tile_rows) * tile_rows
    if rows_padded != rows:
        x2 = jnp.pad(x2, ((0, rows_padded - rows), (0, 0)))
    grid = (rows_padded // tile_rows,)

    # Scoped-VMEM limit sized to the real working set (+ headroom), capped so it
    # is valid on v7x's 64 MiB physical VMEM as well as v5e/v6e.
    working = (2 * tile_rows * (d_in + d_out) * itemsize
               + tile_rows * (d_in + d_hid + d_out) * 4
               + 2 * (d_in * d_hid + d_hid * d_out + d_hid + d_out) * itemsize)
    vmem_limit = int(min(56 * 1024 * 1024, max(32 * 1024 * 1024, working * 2)))

    out2 = pl.pallas_call(
        _ffn_kernel,
        out_shape=jax.ShapeDtypeStruct((rows_padded, d_out), x.dtype),
        grid_spec=pltpu.PrefetchScalarGridSpec(
            num_scalar_prefetch=0,
            grid=grid,
            in_specs=[
                pl.BlockSpec((tile_rows, d_in), lambda i: (i, 0)),
                pl.BlockSpec((d_in, d_hid), lambda i: (0, 0)),
                pl.BlockSpec((1, d_hid), lambda i: (0, 0)),
                pl.BlockSpec((d_hid, d_out), lambda i: (0, 0)),
                pl.BlockSpec((1, d_out), lambda i: (0, 0)),
            ],
            out_specs=pl.BlockSpec((tile_rows, d_out), lambda i: (i, 0)),
        ),
        compiler_params=pltpu.CompilerParams(
            dimension_semantics=("parallel",),   # independent row tiles -> megacore
            vmem_limit_bytes=vmem_limit,
        ),
    )(x2, w1, b1_2, w2, b2_2)

    out2 = out2[:rows]
    return out2.reshape(orig_shape[:-1] + (d_out,))


def position_wise_ffn_reference(x, w1, b1, w2, b2):
    """Pure-JAX reference of the PyTorch module's forward."""
    h = jnp.maximum(jnp.dot(x, w1) + b1, 0.0)
    return jnp.dot(h, w2) + b2


if __name__ == "__main__":
    key = jax.random.PRNGKey(0)
    kx, kw1, kb1, kw2, kb2 = jax.random.split(key, 5)

    # Small shapes consistent with the module: PositionWiseFFN(32, 64, 32)
    batch, seq = 2, 8
    ffn_num_input, ffn_num_hiddens, ffn_num_outputs = 32, 64, 32

    X = jax.random.normal(kx, (batch, seq, ffn_num_input), dtype=jnp.float32)
    W1 = 0.1 * jax.random.normal(kw1, (ffn_num_input, ffn_num_hiddens),
                                 dtype=jnp.float32)
    b1 = 0.1 * jax.random.normal(kb1, (ffn_num_hiddens,), dtype=jnp.float32)
    W2 = 0.1 * jax.random.normal(kw2, (ffn_num_hiddens, ffn_num_outputs),
                                 dtype=jnp.float32)
    b2 = 0.1 * jax.random.normal(kb2, (ffn_num_outputs,), dtype=jnp.float32)

    out = position_wise_ffn(X, W1, b1, W2, b2)
    out = jax.block_until_ready(out)

    ref = position_wise_ffn_reference(X, W1, b1, W2, b2)
    assert out.shape == (batch, seq, ffn_num_outputs)
    assert jnp.allclose(out, ref, atol=1e-5, rtol=1e-5), "mismatch vs reference"
    assert jnp.all(jnp.isfinite(out))

    print("KERNEL_OK")
</pallas_src>

<mosaic_0001>
module attributes {stable_mosaic.version = 11 : i64} {
  func.func @_ffn_kernel(%arg0: i32, %arg1: memref<16x32xf32, #tpu.memory_space<vmem>>, %arg2: memref<32x64xf32, #tpu.memory_space<vmem>>, %arg3: memref<1x64xf32, #tpu.memory_space<vmem>>, %arg4: memref<64x32xf32, #tpu.memory_space<vmem>>, %arg5: memref<1x32xf32, #tpu.memory_space<vmem>>, %arg6: memref<16x32xf32, #tpu.memory_space<vmem>>) attributes {dimension_semantics = [#tpu.dimension_semantics<parallel>], iteration_bounds = array<i64: 1>, scalar_prefetch = 0 : i64, scratch_operands = 0 : i64, tpu.core_type = #tpu.core_type<tc>, window_params = [{transform_indices = @transform_0, window_bounds = array<i64: 16, 32>}, {pipeline_mode = #tpu.pipeline_mode<synchronous>, transform_indices = @transform_1, window_bounds = array<i64: 32, 64>}, {pipeline_mode = #tpu.pipeline_mode<synchronous>, transform_indices = @transform_2, window_bounds = array<i64: 1, 64>}, {pipeline_mode = #tpu.pipeline_mode<synchronous>, transform_indices = @transform_3, window_bounds = array<i64: 64, 32>}, {pipeline_mode = #tpu.pipeline_mode<synchronous>, transform_indices = @transform_4, window_bounds = array<i64: 1, 32>}, {transform_indices = @transform_5, window_bounds = array<i64: 16, 32>}]} {
    %c0 = arith.constant 0 : index
    %c0_0 = arith.constant 0 : index
    %0 = vector.load %arg1[%c0, %c0_0] : memref<16x32xf32, #tpu.memory_space<vmem>>, vector<16x32xf32>
    %c0_1 = arith.constant 0 : index
    %c0_2 = arith.constant 0 : index
    %1 = vector.load %arg2[%c0_1, %c0_2] : memref<32x64xf32, #tpu.memory_space<vmem>>, vector<32x64xf32>
    %cst = arith.constant dense<0.000000e+00> : vector<16x64xf32>
    %2 = tpu.matmul %0, %1, %cst {dimension_numbers = #tpu.dot_dimension_numbers<[1], [0], [0], [1], [0, 0, 1, 1], [], []>} : vector<16x32xf32>, vector<32x64xf32>, vector<16x64xf32> -> vector<16x64xf32>
    %c0_3 = arith.constant 0 : index
    %c0_4 = arith.constant 0 : index
    %3 = vector.load %arg3[%c0_3, %c0_4] : memref<1x64xf32, #tpu.memory_space<vmem>>, vector<1x64xf32>
    %4 = vector.broadcast %3 : vector<1x64xf32> to vector<16x64xf32>
    %5 = arith.addf %2, %4 : vector<16x64xf32>
    %cst_5 = arith.constant 0.000000e+00 : f32
    %6 = vector.broadcast %cst_5 : f32 to vector<16x64xf32>
    %7 = arith.maximumf %5, %6 : vector<16x64xf32>
    %c0_6 = arith.constant 0 : index
    %c0_7 = arith.constant 0 : index
    %8 = vector.load %arg4[%c0_6, %c0_7] : memref<64x32xf32, #tpu.memory_space<vmem>>, vector<64x32xf32>
    %cst_8 = arith.constant dense<0.000000e+00> : vector<16x32xf32>
    %9 = tpu.matmul %7, %8, %cst_8 {dimension_numbers = #tpu.dot_dimension_numbers<[1], [0], [0], [1], [0, 0, 1, 1], [], []>} : vector<16x64xf32>, vector<64x32xf32>, vector<16x32xf32> -> vector<16x32xf32>
    %c0_9 = arith.constant 0 : index
    %c0_10 = arith.constant 0 : index
    %10 = vector.load %arg5[%c0_9, %c0_10] : memref<1x32xf32, #tpu.memory_space<vmem>>, vector<1x32xf32>
    %11 = vector.broadcast %10 : vector<1x32xf32> to vector<16x32xf32>
    %12 = arith.addf %9, %11 : vector<16x32xf32>
    %c0_11 = arith.constant 0 : index
    %c0_12 = arith.constant 0 : index
    %13 = vector.load %arg6[%c0_11, %c0_12] : memref<16x32xf32, #tpu.memory_space<vmem>>, vector<16x32xf32>
    tpu.vector_store %arg6[%c0_11, %c0_12], %12 {strides = array<i32>} : memref<16x32xf32, #tpu.memory_space<vmem>>, vector<16x32xf32>,
    return
  }
  func.func @transform_0(%arg0: i32) -> (i32, i32) {
    %c0_i32 = arith.constant 0 : i32
    %c0_i32_0 = arith.constant 0 : i32
    return %arg0, %c0_i32 : i32, i32
  }
  func.func @transform_1(%arg0: i32) -> (i32, i32) {
    %c0_i32 = arith.constant 0 : i32
    %c0_i32_0 = arith.constant 0 : i32
    %c0_i32_1 = arith.constant 0 : i32
    return %c0_i32, %c0_i32_0 : i32, i32
  }
  func.func @transform_2(%arg0: i32) -> (i32, i32) {
    %c0_i32 = arith.constant 0 : i32
    %c0_i32_0 = arith.constant 0 : i32
    %c0_i32_1 = arith.constant 0 : i32
    return %c0_i32, %c0_i32_0 : i32, i32
  }
  func.func @transform_3(%arg0: i32) -> (i32, i32) {
    %c0_i32 = arith.constant 0 : i32
    %c0_i32_0 = arith.constant 0 : i32
    %c0_i32_1 = arith.constant 0 : i32
    return %c0_i32, %c0_i32_0 : i32, i32
  }
  func.func @transform_4(%arg0: i32) -> (i32, i32) {
    %c0_i32 = arith.constant 0 : i32
    %c0_i32_0 = arith.constant 0 : i32
    %c0_i32_1 = arith.constant 0 : i32
    return %c0_i32, %c0_i32_0 : i32, i32
  }
  func.func @transform_5(%arg0: i32) -> (i32, i32) {
    %c0_i32 = arith.constant 0 : i32
    %c0_i32_0 = arith.constant 0 : i32
    return %arg0, %c0_i32 : i32, i32
  }
}

</mosaic_0001>

<bundles_post_ra>
// kernel: tpu_custom_call.1
= control target key start
LH: loop header
LB: loop body
LE: loop exit
PB: predicated region body
PF: predicated region fallthrough
CT: control target
= control target key end

     0   :  { %vm34_vm0 = vcmask 261120   ;;  %s433_s0 = inlined_call_operand.vmem [shape: f32[16,32], index: 0, kind: input, shape index: {}]   ;;  %s434_s1 = inlined_call_operand.vmem [shape: f32[32,64], index: 1, kind: input, shape index: {}]   ;;  %s435_s2 = inlined_call_operand.vmem [shape: f32[1,64], index: 2, kind: input, shape index: {}]   ;;  %s436_s3 = inlined_call_operand.vmem [shape: f32[64,32], index: 3, kind: input, shape index: {}]   ;;  %s437_s4 = inlined_call_operand.vmem [shape: f32[1,32], index: 4, kind: input, shape index: {}]   ;;  %s438_s5 = inlined_call_operand.hbm [shape: f32[16,32], index: 5, kind: output, shape index: {}]  }
   0x1   :  { %v23_v0 = vld [vmem:[%s434_s1] sm:$0xff]  ;;  %v24_v1 = vld [vmem:[%s434_s1 + $0x8] sm:$0xff]  ;;  %v25_v2 = vld [vmem:[%s434_s1 + $0x10] sm:$0xff] }
   0x2   :  { %v285_v3 = vpack.c.bf16 %v24_v1, %v23_v0  ;;  %v26_v4 = vld [vmem:[%s434_s1 + $0x18] sm:$0xff]  ;;  %v21_v5 = vld [vmem:[%s433_s0] sm:$0xff]  ;;  %v119_v8 = vld [vmem:[%s436_s3 + $0x8] sm:$0xff] }
   0x3   :  { %v289_v6 = vpack.c.bf16 %v26_v4, %v25_v2  ;;  %263 = vmatprep.mubr.msk.f32.mxu0 %vm34_vm0, %v21_v5  ;;  %v118_v7 = vld [vmem:[%s436_s3] sm:$0xff]  ;;  %v120_v9 = vld [vmem:[%s436_s3 + $0x10] sm:$0xff]  ;;  %v121_v11 = vld [vmem:[%s436_s3 + $0x18] sm:$0xff] }
   0x4   :  { %286 = vmatprep.subr.bf16.mxu0 %v285_v3  ;;  %v293_v10 = vpack.c.bf16 %v119_v8, %v118_v7  ;;  %v297_v12 = vpack.c.bf16 %v121_v11, %v120_v9  ;;  %v122_v13 = vld [vmem:[%s436_s3 + $0x20] sm:$0xff]  ;;  %v123_v14 = vld [vmem:[%s436_s3 + $0x28] sm:$0xff] }
   0x5   :  { %288 = vmatpush3.bf16.msra.mxu0 %v285_v3 }
   0x6   :  { %10 = vsyncpa [#allocation3], 0  ;;  %290 = vmatprep.subr.bf16.mxu0 %v289_v6  ;;  %294 = vmatprep.subr.bf16.mxu1 %v293_v10  ;;  %v301_v15 = vpack.c.bf16 %v123_v14, %v122_v13  ;;  %v22_v16 = vld [vmem:[%s433_s0 + $0x8] sm:$0xff]  ;;  %v124_v17 = vld [vmem:[%s436_s3 + $0x30] sm:$0xff]  ;;  %vm133_vm1 = vcmask 523264  }
   0x7   :  { %296 = vmatpush3.bf16.msra.mxu1 %v293_v10  ;;  %v125_v18 = vld [vmem:[%s436_s3 + $0x38] sm:$0xff]  ;;  %v233_v20 = vld [vmem:[%s435_s2] ss:$0 sm:$0xff]  ;;  %s336_s3 = smov [#allocation2]  }
   0x8   :  { %298 = vmatprep.subr.bf16.mxu1 %v297_v12  ;;  %v305_v19 = vpack.c.bf16 %v125_v18, %v124_v17  ;;  %v236_v27 = vld [vmem:[%s437_s4] ss:$0 sm:$0xff]  ;;  %s222_s23 = sshll.u32 %s336_s3, 4  ;;  %s223_s23 = int_to_ptr.vmem [resolvable:$true] %s222_s23 }
   0x9   :  { %292 = vmatpush3.bf16.msra.mxu0 %v289_v6  ;;  %s312_s2 = scalar_lea.vmem %s223_s23, 256  ;;  %p317_p1 = scmp.lt.s32.totalorder %s223_s23, %s223_s23 }
   0xa   :  { %p313_p0 = scmp.ne.s32.totalorder %s223_s23, %s312_s2  ;;  %p318_p2 = scmp.lt.s32.totalorder %s312_s2, %s312_s2 }
   0xb   :  { %300 = vmatpush3.bf16.msra.mxu1 %v297_v12 }
   0xc   :  { %264 = vmatmul.mubr.msk.f32.vlgmr.msra.gmra.mrb[0].mxu0 %vm34_vm0, %v22_v16  ;;  %302 = vmatprep.subr.bf16.mxu1 %v301_v15  ;;  %p319_p3 = por %p318_p2, %p317_p1 }
   0xe   :  { %p320_p4 = pnand %p319_p3, %p313_p0 }
   0xf   :  { %304 = vmatpush3.bf16.msra.mxu1 %v301_v15 }
  0x10   :  { %306 = vmatprep.subr.bf16.mxu1 %v305_v19 }
  0x13   :  { %308 = vmatpush3.bf16.msra.mxu1 %v305_v19 }
  0xdf   :  { %v265_v21 = vpop.f32.mrb[0].mxu0 }
  0xe0   :  { %v113_v22 = vadd.f32 %v265_v21, %v233_v20  ;;  %v107_v23 = vpop.f32.mrb[1].mxu0 }
  0xe1   :  { %v108_v24 = vadd.f32 %v233_v20, %v107_v23 }
  0xe2   :  { %v117_v26 = vmax.f32 %v113_v22, 0.0 }
  0xe3   :  { %v116_v25 = vmax.f32 %v108_v24, 0.0 }
  0xe5   :  { %282 = vmatprep.mubr.msk.f32.mxu1 %vm133_vm1, %v116_v25 }
  0xe6   :  { %283 = vmatmul.mubr.msk.f32.vlgmr.msra.gmra.mrb[0].mxu1 %vm133_vm1, %v117_v26 }
 0x1b9   :  { %v284_v28 = vpop.f32.mrb[0].mxu1 }
 0x1ba   :  { %v212_v29 = vadd.f32 %v284_v28, %v236_v27  ;;  %v206_v30 = vpop.f32.mrb[1].mxu1 }
 0x1bb   :  { %v207_v31 = vadd.f32 %v236_v27, %v206_v30 }
 0x1bc   :  { %216 = vst.msk [vmem:[#allocation2 + $0x8] sm:$0xff] %vm34_vm0, %v212_v29 }
 0x1bd   :  { %215 = vst.msk [vmem:[#allocation2] sm:$0xff] %vm34_vm0, %v207_v31 }
 0x1be   :  { %323 = shalt.err (!%p320_p4)
}
 0x1bf   :  { %s324_s25 = scalar_lea.hbm %s438_s5, 256 }
 0x1c0   :  { %p325_p5 = scmp.ne.s32.totalorder %s438_s5, %s324_s25  ;;  %p328_p6 = scmp.lt.u32.totalorder %s324_s25, %s438_s5 }
 0x1c2   :  { %p330_p7 = pnand %p328_p6, %p325_p5 }
 0x1c4   :  { %333 = shalt.err (!%p330_p7)
}
 0x1c5   :  { %s337_s30 = smov 128   ;;  %s338_s6 = smov 8  }
 0x1c6   :  { %228 = dma.vmem_to_hbm [thread:$0]  %s223_s23, 256, %s438_s5, [#allocation3], %s337_s30, %s337_s30, %s338_s6  }
 0x1c7   :  { %334 = dma.done.wait [#allocation3], 256  }
 0x1c8   :  { %335 = vsyncadd [#allocation3], 4294967040 }
 0x1c9   :  { %232 = vsyncpa [#allocation3], 1 }

</bundles_post_ra>
